<compile_context>
chip_gen: v7x
topology: tpu7x:2x2x1
jax: 0.10.0
libtpu: 0.0.40
codegen_flags: <defaults>
</compile_context>

<pallas_src>
import jax
import jax.numpy as jnp
from jax.experimental import pallas as pl
from jax.experimental.pallas import tpu as pltpu


H_PAD = 128  # hidden dim 50 padded to one full lane group


def _round_up(n, m):
    return ((n + m - 1) // m) * m


def _mlp_kernel(x_ref, w1_ref, b1_ref, w2_ref, b2_ref, o_ref):
    # x_ref : (TILE_B, 10)  f32   (batch tile)
    # w1_ref: (10, 128)     f32   (resident, zero-padded hidden cols)
    # b1_ref: (1, 128)      f32   (resident)
    # w2_ref: (1, 128)      f32   (resident, w2^T zero-padded)
    # b2_ref: (1,)          f32   (SMEM scalar)
    # o_ref : (1, TILE_B)   f32   (lane-dense output row)
    x = x_ref[...]

    # Layer 1 on the MXU with explicit f32 accumulation.
    h = jnp.dot(x, w1_ref[...], preferred_element_type=jnp.float32)  # (TILE_B, 128)
    h = jnp.maximum(h + b1_ref[...], 0.0)                            # bias + ReLU (VPU)

    # Layer 2 as a lane-dense row:  y^T = w2_row . h^T  -> (1, TILE_B).
    # Contraction over the last dims of both operands (q.k^T pattern) keeps the
    # transposed operand perfectly (8,128)-aligned.
    y = jax.lax.dot_general(
        w2_ref[...], h,
        dimension_numbers=(((1,), (1,)), ((), ())),
        preferred_element_type=jnp.float32,
    )                                                                # (1, TILE_B)

    o_ref[...] = (y + b2_ref[0]).astype(o_ref.dtype)


def simple_net_forward(x, w1, b1, w2, b2, *, tile_b=2048):
    """x: (B, 10); w1: (10, 50); b1: (50,); w2: (50, 1); b2: (1,). Returns (B, 1)."""
    B, d_in = x.shape
    d_hid = w1.shape[1]
    d_out = w2.shape[1]
    assert d_hid <= H_PAD and d_out == 1

    # One-time KB-scale parameter padding to clean (8,128)-friendly shapes.
    # TODO(synk): in a real deployment pad these once at parameter-load time.
    w1p = jnp.pad(w1, ((0, 0), (0, H_PAD - d_hid)))                     # (10, 128)
    b1p = jnp.pad(b1, (0, H_PAD - d_hid)).reshape(1, H_PAD)             # (1, 128)
    w2row = jnp.pad(w2[:, 0], (0, H_PAD - d_hid)).reshape(1, H_PAD)     # (1, 128)
    b2s = b2.reshape(1).astype(jnp.float32)                             # SMEM scalar

    # Batch tiling: clamp tile size for small B, pad B up to a tile multiple.
    tile_b = max(128, min(tile_b, _round_up(B, 128)))
    n_tiles = pl.cdiv(B, tile_b)
    b_pad = n_tiles * tile_b
    x_pad = jnp.pad(x, ((0, b_pad - B), (0, 0))) if b_pad != B else x

    out_row = pl.pallas_call(
        _mlp_kernel,
        out_shape=jax.ShapeDtypeStruct((1, b_pad), x.dtype),
        grid=(n_tiles,),
        in_specs=[
            pl.BlockSpec((tile_b, d_in), lambda i: (i, 0)),   # x tile (pipelined)
            pl.BlockSpec((d_in, H_PAD), lambda i: (0, 0)),    # w1 (resident)
            pl.BlockSpec((1, H_PAD), lambda i: (0, 0)),       # b1 (resident)
            pl.BlockSpec((1, H_PAD), lambda i: (0, 0)),       # w2^T (resident)
            pl.BlockSpec(memory_space=pltpu.MemorySpace.SMEM),  # b2 scalar
        ],
        out_specs=pl.BlockSpec((1, tile_b), lambda i: (0, i)),
        compiler_params=pltpu.CompilerParams(
            dimension_semantics=("parallel",),
        ),
    )(x_pad, w1p, b1p, w2row, b2s)

    return out_row[0, :B].reshape(B, d_out)


def reference_forward(x, w1, b1, w2, b2):
    h = jnp.maximum(x @ w1 + b1, 0.0)
    return h @ w2 + b2


if __name__ == "__main__":
    key = jax.random.PRNGKey(0)
    k_x, k_w1, k_b1, k_w2, k_b2 = jax.random.split(key, 5)

    B, D_IN, D_HID, D_OUT = 8, 10, 50, 1

    x = jax.random.normal(k_x, (B, D_IN), dtype=jnp.float32)

    # Deterministic parameter init (matches nn.Linear shapes; stored as (in, out)).
    bound1 = 1.0 / jnp.sqrt(D_IN)
    w1 = jax.random.uniform(k_w1, (D_IN, D_HID), minval=-bound1, maxval=bound1,
                            dtype=jnp.float32)
    b1 = jax.random.uniform(k_b1, (D_HID,), minval=-bound1, maxval=bound1,
                            dtype=jnp.float32)
    bound2 = 1.0 / jnp.sqrt(D_HID)
    w2 = jax.random.uniform(k_w2, (D_HID, D_OUT), minval=-bound2, maxval=bound2,
                            dtype=jnp.float32)
    b2 = jax.random.uniform(k_b2, (D_OUT,), minval=-bound2, maxval=bound2,
                            dtype=jnp.float32)

    out = simple_net_forward(x, w1, b1, w2, b2)
    out = jax.block_until_ready(out)

    ref = reference_forward(x, w1, b1, w2, b2)
    assert out.shape == (B, D_OUT), out.shape
    assert jnp.allclose(out, ref, atol=1e-5, rtol=1e-5), "mismatch vs reference"

    print("KERNEL_OK")
</pallas_src>

<mosaic_0001>
module attributes {stable_mosaic.version = 11 : i64} {
  func.func @_mlp_kernel(%arg0: i32, %arg1: memref<128x10xf32, #tpu.memory_space<vmem>>, %arg2: memref<10x128xf32, #tpu.memory_space<vmem>>, %arg3: memref<1x128xf32, #tpu.memory_space<vmem>>, %arg4: memref<1x128xf32, #tpu.memory_space<vmem>>, %arg5: memref<1xf32, #tpu.memory_space<smem>>, %arg6: memref<1x128xf32, #tpu.memory_space<vmem>>) attributes {dimension_semantics = [#tpu.dimension_semantics<parallel>], iteration_bounds = array<i64: 1>, scalar_prefetch = 0 : i64, scratch_operands = 0 : i64, tpu.core_type = #tpu.core_type<tc>, window_params = [{transform_indices = @transform_0, window_bounds = array<i64: 128, 10>}, {pipeline_mode = #tpu.pipeline_mode<synchronous>, transform_indices = @transform_1, window_bounds = array<i64: 10, 128>}, {pipeline_mode = #tpu.pipeline_mode<synchronous>, transform_indices = @transform_2, window_bounds = array<i64: 1, 128>}, {pipeline_mode = #tpu.pipeline_mode<synchronous>, transform_indices = @transform_3, window_bounds = array<i64: 1, 128>}, {transform_indices = @transform_4, window_bounds = array<i64: 1>}, {transform_indices = @transform_5, window_bounds = array<i64: 1, 128>}]} {
    %c0 = arith.constant 0 : index
    %c0_0 = arith.constant 0 : index
    %0 = vector.load %arg1[%c0, %c0_0] : memref<128x10xf32, #tpu.memory_space<vmem>>, vector<128x10xf32>
    %c0_1 = arith.constant 0 : index
    %c0_2 = arith.constant 0 : index
    %1 = vector.load %arg2[%c0_1, %c0_2] : memref<10x128xf32, #tpu.memory_space<vmem>>, vector<10x128xf32>
    %cst = arith.constant dense<0.000000e+00> : vector<128x128xf32>
    %2 = tpu.matmul %0, %1, %cst {dimension_numbers = #tpu.dot_dimension_numbers<[1], [0], [0], [1], [0, 0, 1, 1], [], []>} : vector<128x10xf32>, vector<10x128xf32>, vector<128x128xf32> -> vector<128x128xf32>
    %c0_3 = arith.constant 0 : index
    %c0_4 = arith.constant 0 : index
    %3 = vector.load %arg3[%c0_3, %c0_4] : memref<1x128xf32, #tpu.memory_space<vmem>>, vector<1x128xf32>
    %4 = vector.broadcast %3 : vector<1x128xf32> to vector<128x128xf32>
    %5 = arith.addf %2, %4 : vector<128x128xf32>
    %cst_5 = arith.constant 0.000000e+00 : f32
    %6 = vector.broadcast %cst_5 : f32 to vector<128x128xf32>
    %7 = arith.maximumf %5, %6 : vector<128x128xf32>
    %c0_6 = arith.constant 0 : index
    %c0_7 = arith.constant 0 : index
    %8 = vector.load %arg4[%c0_6, %c0_7] : memref<1x128xf32, #tpu.memory_space<vmem>>, vector<1x128xf32>
    %cst_8 = arith.constant dense<0.000000e+00> : vector<1x128xf32>
    %9 = tpu.matmul %8, %7, %cst_8 {dimension_numbers = #tpu.dot_dimension_numbers<[1], [1], [0], [0], [0, 0, 1, 0], [], []>} : vector<1x128xf32>, vector<128x128xf32>, vector<1x128xf32> -> vector<1x128xf32>
    %c0_9 = arith.constant 0 : index
    %10 = memref.load %arg5[%c0_9] : memref<1xf32, #tpu.memory_space<smem>>
    %11 = vector.broadcast %10 : f32 to vector<1x128xf32>
    %12 = arith.addf %9, %11 : vector<1x128xf32>
    %c0_10 = arith.constant 0 : index
    %c0_11 = arith.constant 0 : index
    %13 = vector.load %arg6[%c0_10, %c0_11] : memref<1x128xf32, #tpu.memory_space<vmem>>, vector<1x128xf32>
    tpu.vector_store %arg6[%c0_10, %c0_11], %12 {strides = array<i32>} : memref<1x128xf32, #tpu.memory_space<vmem>>, vector<1x128xf32>,
    return
  }
  func.func @transform_0(%arg0: i32) -> (i32, i32) {
    %c0_i32 = arith.constant 0 : i32
    %c0_i32_0 = arith.constant 0 : i32
    return %arg0, %c0_i32 : i32, i32
  }
  func.func @transform_1(%arg0: i32) -> (i32, i32) {
    %c0_i32 = arith.constant 0 : i32
    %c0_i32_0 = arith.constant 0 : i32
    %c0_i32_1 = arith.constant 0 : i32
    return %c0_i32, %c0_i32_0 : i32, i32
  }
  func.func @transform_2(%arg0: i32) -> (i32, i32) {
    %c0_i32 = arith.constant 0 : i32
    %c0_i32_0 = arith.constant 0 : i32
    %c0_i32_1 = arith.constant 0 : i32
    return %c0_i32, %c0_i32_0 : i32, i32
  }
  func.func @transform_3(%arg0: i32) -> (i32, i32) {
    %c0_i32 = arith.constant 0 : i32
    %c0_i32_0 = arith.constant 0 : i32
    %c0_i32_1 = arith.constant 0 : i32
    return %c0_i32, %c0_i32_0 : i32, i32
  }
  func.func @transform_4(%arg0: i32) -> i32 {
    %c0_i32 = arith.constant 0 : i32
    %c0_i32_0 = arith.constant 0 : i32
    return %c0_i32 : i32
  }
  func.func @transform_5(%arg0: i32) -> (i32, i32) {
    %c0_i32 = arith.constant 0 : i32
    %c0_i32_0 = arith.constant 0 : i32
    return %c0_i32, %arg0 : i32, i32
  }
}

</mosaic_0001>

<bundles_post_ra>
// kernel: tpu_custom_call.1
= control target key start
LH: loop header
LB: loop body
LE: loop exit
PB: predicated region body
PF: predicated region fallthrough
CT: control target
= control target key end

     0   :  { %vm96_vm0 = vcmask 1041408   ;;  %vm524_vm1 = vmmov 1   ;;  %vm47_vm3 = vcmask 80896   ;;  %s658_s0 = inlined_call_operand.vmem [shape: f32[128,10], index: 0, kind: input, shape index: {}]   ;;  %s659_s1 = inlined_call_operand.vmem [shape: f32[10,128], index: 1, kind: input, shape index: {}]   ;;  %s660_s2 = inlined_call_operand.vmem [shape: f32[1,128], index: 2, kind: input, shape index: {}]   ;;  %s661_s3 = inlined_call_operand.vmem [shape: f32[1,128], index: 3, kind: input, shape index: {}]   ;;  %s662_s4 = inlined_call_operand.<no memory space> [shape: f32[1], index: 4, kind: input, shape index: {}]   ;;  %s663_s5 = inlined_call_operand.hbm [shape: f32[1,128], index: 5, kind: output, shape index: {}]  }
   0x1   :  { %v38_v0 = vld [vmem:[%s659_s1] sm:$0xff]  ;;  %v39_v1 = vld [vmem:[%s659_s1 + $0x8] sm:$0x3]  ;;  %vm466_vm2 = vmpackc.low %vm96_vm0, %vm524_vm1 }
   0x2   :  { %v22_v2 = vld [vmem:[%s658_s0] sm:$0xff]  ;;  %v465_v3 = vpack.c.bf16 %v39_v1, %v38_v0  ;;  %v23_v4 = vld [vmem:[%s658_s0 + $0x8] sm:$0xff]  ;;  %v24_v5 = vld [vmem:[%s658_s0 + $0x10] sm:$0xff] }
   0x3   :  { %406 = vmatprep.mubr.msk.f32.mxu0 %vm47_vm3, %v22_v2 }
   0x4   :  { %467 = vmatprep.subr.msk.bf16.mxu0 %vm466_vm2, %v465_v3 }
   0x5   :  { %470 = vmatpush3.bf16.msk.msra.mxu0 %vm466_vm2, %v465_v3 }
   0x6   :  { %11 = vsyncpa [#allocation4], 0  ;;  %v25_v6 = vld [vmem:[%s658_s0 + $0x18] sm:$0xff]  ;;  %v26_v7 = vld [vmem:[%s658_s0 + $0x20] sm:$0xff]  ;;  %v525_v19 = vmov 0.0|0.0   ;;  %vm526_vm4 = vmmov 0  }
   0x7   :  { %v27_v8 = vld [vmem:[%s658_s0 + $0x28] sm:$0xff]  ;;  %v28_v9 = vld [vmem:[%s658_s0 + $0x30] sm:$0xff]  ;;  %v29_v10 = vld [vmem:[%s658_s0 + $0x38] sm:$0xff]  ;;  %471 = vmatprep.subr.bf16.mxu1 %v525_v19  ;;  %v527_v20 = vmov 0.0   ;;  %s528_s6 = smov [#allocation3]  }
   0x8   :  { %407 = vmatmul.mubr.msk.f32.vlgmr.msra.gmra.mrb[0].mxu0 %vm47_vm3, %v23_v4  ;;  %v30_v11 = vld [vmem:[%s658_s0 + $0x40] sm:$0xff]  ;;  %v31_v12 = vld [vmem:[%s658_s0 + $0x48] sm:$0xff]  ;;  %v32_v13 = vld [vmem:[%s658_s0 + $0x50] sm:$0xff]  ;;  %462 = vmatprep.mubr.msk.f32.mxu1 %vm526_vm4, %v527_v20  ;;  %s341_s7 = sshll.u32 %s528_s6, 4  ;;  %s342_s7 = int_to_ptr.vmem [resolvable:$true] %s341_s7 }
   0x9   :  { %409 = vmatprep.mubr.msk.f32.mxu0 %vm47_vm3, %v24_v5  ;;  %v33_v14 = vld [vmem:[%s658_s0 + $0x58] sm:$0xff]  ;;  %v34_v15 = vld [vmem:[%s658_s0 + $0x60] sm:$0xff]  ;;  %v35_v16 = vld [vmem:[%s658_s0 + $0x68] sm:$0xff]  ;;  %s500_s8 = scalar_lea.vmem %s342_s7, 16  ;;  %s504_s9 = scalar_lea.vmem %s342_s7, 32 }
   0xa   :  { %v36_v17 = vld [vmem:[%s658_s0 + $0x70] sm:$0xff]  ;;  %v37_v18 = vld [vmem:[%s658_s0 + $0x78] sm:$0xff]  ;;  %v349_v21 = vld [vmem:[%s660_s2] ss:$0 sm:$0xff]  ;;  %p501_p0 = scmp.ne.s32.totalorder %s342_s7, %s500_s8  ;;  %p505_p1 = scmp.lt.s32.totalorder %s342_s7, %s342_s7 }
   0xb   :  { %p506_p2 = scmp.lt.s32.totalorder %s504_s9, %s500_s8 }
   0xc   :  { %410 = vmatmul.mubr.msk.f32.gmra.mrb[2].mxu0 %vm47_vm3, %v25_v6 }
   0xd   :  { %412 = vmatprep.mubr.msk.f32.mxu0 %vm47_vm3, %v26_v7  ;;  %p507_p3 = por %p506_p2, %p505_p1 }
   0xf   :  { %p508_p4 = pnand %p507_p3, %p501_p0 }
  0x10   :  { %413 = vmatmul.mubr.msk.f32.gmra.mrb[4].mxu0 %vm47_vm3, %v27_v8 }
  0x11   :  { %415 = vmatprep.mubr.msk.f32.mxu0 %vm47_vm3, %v28_v9 }
  0x14   :  { %416 = vmatmul.mubr.msk.f32.gmra.mrb[6].mxu0 %vm47_vm3, %v29_v10 }
  0x15   :  { %418 = vmatprep.mubr.msk.f32.mxu0 %vm47_vm3, %v30_v11 }
  0x18   :  { %419 = vmatmul.mubr.msk.f32.gmra.mrb[8].mxu0 %vm47_vm3, %v31_v12 }
  0x19   :  { %421 = vmatprep.mubr.msk.f32.mxu0 %vm47_vm3, %v32_v13 }
  0x1c   :  { %422 = vmatmul.mubr.msk.f32.gmra.mrb[10].mxu0 %vm47_vm3, %v33_v14  ;;  %v261_v14 = vld [vmem:[%s661_s3] sm:$0x1] }
  0x1d   :  { %424 = vmatprep.mubr.msk.f32.mxu0 %vm47_vm3, %v34_v15  ;;  %v263_v15 = vstv %s662_s4 }
  0x20   :  { %425 = vmatmul.mubr.msk.f32.gmra.mrb[12].mxu0 %vm47_vm3, %v35_v16 }
  0x21   :  { %427 = vmatprep.mubr.msk.f32.mxu0 %vm47_vm3, %v36_v17 }
  0x24   :  { %428 = vmatmul.mubr.msk.f32.gmra.mrb[14].mxu0 %vm47_vm3, %v37_v18 }
  0xdb   :  { %v408_v22 = vpop.f32.mrb[0].mxu0 }
  0xdc   :  { %v172_v23 = vadd.f32 %v408_v22, %v349_v21  ;;  %v166_v24 = vpop.f32.mrb[1].mxu0 }
  0xdd   :  { %v167_v25 = vadd.f32 %v349_v21, %v166_v24 }
  0xde   :  { %v246_v26 = vmax.f32 %v172_v23, 0.0 }
  0xdf   :  { %v245_v27 = vmax.f32 %v167_v25, 0.0  ;;  %v411_v28 = vpop.f32.mrb[2].mxu0 }
  0xe0   :  { %v182_v29 = vadd.f32 %v411_v28, %v349_v21  ;;  %v176_v30 = vpop.f32.mrb[3].mxu0 }
  0xe1   :  { %v177_v31 = vadd.f32 %v349_v21, %v176_v30  ;;  %v472_v32 = vpack.c.bf16 %v246_v26, %v245_v27 }
  0xe2   :  { %v248_v33 = vmax.f32 %v182_v29, 0.0 }
  0xe3   :  { %v247_v34 = vmax.f32 %v177_v31, 0.0  ;;  %473 = vmatpush3.bf16.xpose.msra.mxu1 %v472_v32  ;;  %v414_v35 = vpop.f32.mrb[4].mxu0 }
  0xe4   :  { %v192_v36 = vadd.f32 %v414_v35, %v349_v21  ;;  %474 = vmatprep.subr.bf16.mxu1 %v525_v19  ;;  %v186_v37 = vpop.f32.mrb[5].mxu0 }
  0xe5   :  { %v475_v38 = vpack.c.bf16 %v248_v33, %v247_v34  ;;  %v187_v39 = vadd.f32 %v349_v21, %v186_v37 }
  0xe6   :  { %v250_v40 = vmax.f32 %v192_v36, 0.0 }
  0xe7   :  { %v249_v41 = vmax.f32 %v187_v39, 0.0  ;;  %v417_v42 = vpop.f32.mrb[6].mxu0 }
  0xe8   :  { %v202_v43 = vadd.f32 %v417_v42, %v349_v21  ;;  %v196_v44 = vpop.f32.mrb[7].mxu0 }
  0xe9   :  { %v478_v45 = vpack.c.bf16 %v250_v40, %v249_v41  ;;  %v197_v46 = vadd.f32 %v349_v21, %v196_v44 }
  0xea   :  { %v252_v47 = vmax.f32 %v202_v43, 0.0 }
  0xeb   :  { %476 = vmatpush3.bf16.xpose.msra.mxu1 %v475_v38  ;;  %v251_v48 = vmax.f32 %v197_v46, 0.0  ;;  %v420_v49 = vpop.f32.mrb[8].mxu0 }
  0xec   :  { %477 = vmatprep.subr.bf16.mxu1 %v525_v19  ;;  %v212_v50 = vadd.f32 %v420_v49, %v349_v21  ;;  %v206_v51 = vpop.f32.mrb[9].mxu0 }
  0xed   :  { %v481_v52 = vpack.c.bf16 %v252_v47, %v251_v48  ;;  %v207_v53 = vadd.f32 %v349_v21, %v206_v51 }
  0xee   :  { %v254_v54 = vmax.f32 %v212_v50, 0.0 }
  0xef   :  { %v253_v55 = vmax.f32 %v207_v53, 0.0  ;;  %v423_v56 = vpop.f32.mrb[10].mxu0 }
  0xf0   :  { %v222_v57 = vadd.f32 %v423_v56, %v349_v21  ;;  %v216_v58 = vpop.f32.mrb[11].mxu0 }
  0xf1   :  { %v484_v59 = vpack.c.bf16 %v254_v54, %v253_v55  ;;  %v217_v60 = vadd.f32 %v349_v21, %v216_v58 }
  0xf2   :  { %v256_v61 = vmax.f32 %v222_v57, 0.0 }
  0xf3   :  { %479 = vmatpush3.bf16.xpose.msra.mxu1 %v478_v45  ;;  %v255_v62 = vmax.f32 %v217_v60, 0.0  ;;  %v426_v63 = vpop.f32.mrb[12].mxu0 }
  0xf4   :  { %480 = vmatprep.subr.bf16.mxu1 %v525_v19  ;;  %v232_v0 = vadd.f32 %v426_v63, %v349_v21  ;;  %v226_v1 = vpop.f32.mrb[13].mxu0 }
  0xf5   :  { %v487_v2 = vpack.c.bf16 %v256_v61, %v255_v62  ;;  %v227_v3 = vadd.f32 %v349_v21, %v226_v1 }
  0xf6   :  { %v258_v4 = vmax.f32 %v232_v0, 0.0 }
  0xf7   :  { %v257_v5 = vmax.f32 %v227_v3, 0.0  ;;  %v429_v6 = vpop.f32.mrb[14].mxu0 }
  0xf8   :  { %v242_v7 = vadd.f32 %v429_v6, %v349_v21  ;;  %v236_v8 = vpop.f32.mrb[15].mxu0 }
  0xf9   :  { %v490_v9 = vpack.c.bf16 %v258_v4, %v257_v5  ;;  %v237_v10 = vadd.f32 %v349_v21, %v236_v8 }
  0xfa   :  { %v260_v11 = vmax.f32 %v242_v7, 0.0 }
  0xfb   :  { %482 = vmatpush3.bf16.xpose.msra.mxu1 %v481_v52  ;;  %v259_v12 = vmax.f32 %v237_v10, 0.0 }
  0xfc   :  { %483 = vmatprep.subr.bf16.mxu1 %v525_v19 }
  0xfd   :  { %v493_v13 = vpack.c.bf16 %v260_v11, %v259_v12 }
 0x103   :  { %485 = vmatpush3.bf16.xpose.msra.mxu1 %v484_v59 }
 0x104   :  { %486 = vmatprep.subr.bf16.mxu1 %v525_v19 }
 0x10b   :  { %488 = vmatpush3.bf16.xpose.msra.mxu1 %v487_v2 }
 0x10c   :  { %489 = vmatprep.subr.bf16.mxu1 %v525_v19 }
 0x113   :  { %491 = vmatpush3.bf16.xpose.msra.mxu1 %v490_v9 }
 0x114   :  { %492 = vmatprep.subr.bf16.mxu1 %v525_v19 }
 0x11b   :  { %494 = vmatpush3.bf16.xpose.msra.mxu1 %v493_v13 }
 0x122   :  { %463 = vmatmul.mubr.f32.vlgmr.msra.gmra.mrb[0].mxu1 %v261_v14 }
 0x1f5   :  { %v330_v16 = vpop.f32.mrb[0].mxu1 }
 0x1f6   :  { %v331_v17 = vadd.f32 %v330_v16, %v263_v15  ;;  %v464_v18 = vpop.f32.mrb[1].mxu1 }
 0x1f8   :  { %334 = vst [vmem:[#allocation3] sm:$0x1] %v331_v17 }
 0x1f9   :  { %511 = shalt.err (!%p508_p4)
}
 0x1fa   :  { %s512_s11 = scalar_lea.hbm %s663_s5, 16 }
 0x1fb   :  { %p513_p5 = scmp.ne.s32.totalorder %s663_s5, %s512_s11  ;;  %p516_p6 = scmp.lt.u32.totalorder %s512_s11, %s663_s5 }
 0x1fd   :  { %p518_p7 = pnand %p516_p6, %p513_p5 }
 0x1ff   :  { %521 = shalt.err (!%p518_p7)
}
 0x200   :  { %344 = dma.vmem_to_hbm [thread:$0]  %s342_s7, 16, %s663_s5, [#allocation4]  }
 0x201   :  { %522 = dma.done.wait [#allocation4], 16  }
 0x202   :  { %523 = vsyncadd [#allocation4], 4294967280 }
 0x203   :  { %348 = vsyncpa [#allocation4], 1 }

</bundles_post_ra>
